<compile_context>
chip_gen: v6e
topology: v6e:2x2x1
jax: 0.10.0
libtpu: 0.0.40
codegen_flags: <defaults>
</compile_context>

<pallas_src>
import functools

import jax
import jax.numpy as jnp
from jax import lax
from jax.experimental import pallas as pl
from jax.experimental.pallas import tpu as pltpu
from jax.scipy.linalg import block_diag


def _round_up(x, m):
    return ((x + m - 1) // m) * m


def controller_kernel(x_ref, t_ref, w1x_ref, w1t_ref, b1_ref,
                      w2_ref, b2_ref, w3_ref, b3_ref, out_ref,
                      *, chunk_rows):
    # Weights / biases use the same block every grid step -> VMEM-resident.
    w1x = w1x_ref[...]
    w1t = w1t_ref[...]
    b1 = b1_ref[...]
    w2 = w2_ref[...]
    b2 = b2_ref[...]
    w3 = w3_ref[...]
    b3 = b3_ref[...]

    n_chunks = x_ref.shape[0] // chunk_rows

    def body(c, carry):
        r0 = pl.multiple_of(c * chunk_rows, chunk_rows)
        x = x_ref[pl.ds(r0, chunk_rows), :]
        t = t_ref[pl.ds(r0, chunk_rows), :]

        # fc1: X @ W1x + T @ W1t + b1, ReLU.  (block-diagonal packed weights)
        h1 = jnp.dot(x, w1x, preferred_element_type=jnp.float32)
        h1 = h1 + jnp.dot(t, w1t, preferred_element_type=jnp.float32)
        h1 = jnp.maximum(h1 + b1, 0.0)

        # fc2 + ReLU (cast activations to weight dtype so bf16 path hits the
        # bf16 MXU; accumulation stays f32).
        h2 = jnp.dot(h1.astype(w2.dtype), w2, preferred_element_type=jnp.float32)
        h2 = jnp.maximum(h2 + b2, 0.0)

        # fc3 (no activation)
        a = jnp.dot(h2.astype(w3.dtype), w3, preferred_element_type=jnp.float32) + b3
        out_ref[pl.ds(r0, chunk_rows), :] = a.astype(out_ref.dtype)
        return carry

    lax.fori_loop(0, n_chunks, body, 0, unroll=True)


def controller_forward(X, T, params, *, block_b=8192, group=4, input_dtype=None):
    """X: [B, d_state], T: [B, 1] -> A: [B, d_action].

    params = (w1, b1, w2, b2, w3, b3) with weights stored as [in, out].
    `group` packs that many batch rows into the lane dimension (g=4 -> 128-wide
    hidden activations).  `input_dtype=jnp.bfloat16` halves HBM read traffic on
    v5e/v6e/v7x (accumulation stays f32).
    """
    w1, b1, w2, b2, w3, b3 = params
    B, d_state = X.shape
    d_action = w3.shape[1]
    g = int(group)

    # ---- Lane-packed (block-diagonal) weights; built once, tiny (<=128x128).
    w1x, w1t = w1[:d_state, :], w1[d_state:, :]
    w1x_p = block_diag(*([w1x] * g))                  # [g*ds, g*32]
    w1t_p = block_diag(*([w1t] * g))                  # [g,    g*32]
    w2_p = block_diag(*([w2] * g))                    # [g*32, g*32]
    w3_p = block_diag(*([w3] * g))                    # [g*32, g*da]
    b1_p = jnp.tile(b1.reshape(1, -1), (1, g)).astype(jnp.float32)
    b2_p = jnp.tile(b2.reshape(1, -1), (1, g)).astype(jnp.float32)
    b3_p = jnp.tile(b3.reshape(1, -1), (1, g)).astype(jnp.float32)

    if input_dtype is not None:
        X = X.astype(input_dtype)
        T = T.astype(input_dtype)
        w1x_p = w1x_p.astype(input_dtype)
        w1t_p = w1t_p.astype(input_dtype)
        w2_p = w2_p.astype(input_dtype)
        w3_p = w3_p.astype(input_dtype)

    # ---- Batch tiling.  bt/g (packed rows) must be a multiple of 8.
    row_mult = 8 * g
    bt = min(int(block_b), _round_up(B, row_mult))
    bt = _round_up(bt, row_mult)
    # v7x megacore: make the "parallel" batch axis have >=2 grid steps whenever
    # the batch is big enough to split (irrelevant but harmless on v5e/v6e).
    if B > 2 * row_mult and pl.cdiv(B, bt) < 2:
        bt = _round_up(-(-B // 2), row_mult)
    # In-kernel sub-chunking: keep [chunk, g*32] activations register-resident.
    if bt // g >= 128:
        bt = _round_up(bt, 128 * g)
        chunk_rows = 128
    else:
        chunk_rows = bt // g

    n_blocks = pl.cdiv(B, bt)
    Bp = n_blocks * bt
    if Bp != B:
        X = jnp.pad(X, ((0, Bp - B), (0, 0)))
        T = jnp.pad(T, ((0, Bp - B), (0, 0)))

    # Row-major reshapes are free: pack g consecutive batch rows into lanes.
    Xp = X.reshape(Bp // g, g * d_state)
    Tp = T.reshape(Bp // g, g)

    bt_g = bt // g
    row_tile = lambda cols: pl.BlockSpec((bt_g, cols), lambda i: (i, 0))
    resident = lambda arr: pl.BlockSpec(arr.shape, lambda i: (0, 0))

    in_specs = [
        row_tile(g * d_state),            # packed X
        row_tile(g),                      # packed T
        resident(w1x_p), resident(w1t_p), resident(b1_p),
        resident(w2_p), resident(b2_p),
        resident(w3_p), resident(b3_p),
    ]
    out_specs = row_tile(g * d_action)

    in_itemsize = jnp.dtype(Xp.dtype).itemsize
    weight_bytes = sum(int(a.size) * jnp.dtype(a.dtype).itemsize
                       for a in (w1x_p, w1t_p, b1_p, w2_p, b2_p, w3_p, b3_p))
    cost = pl.CostEstimate(
        flops=2 * Bp * g * (d_state * 32 + 32 + 32 * 32 + 32 * d_action),
        transcendentals=0,
        bytes_accessed=Bp * (d_state + 1) * in_itemsize    # X, T reads
        + Bp * d_action * 4                                # output writes
        + weight_bytes,
    )

    # Explicit VMEM budget: double-buffered streamed tiles + resident weights
    # + headroom.  Keeps v7x (64 MiB physical / 32 MiB default scoped) happy.
    tile_bytes = (bt_g * g * d_state * in_itemsize
                  + bt_g * g * in_itemsize
                  + bt_g * g * d_action * 4)
    vmem_limit = int(min(100 << 20, 2 * tile_bytes + weight_bytes + (16 << 20)))

    kernel = functools.partial(controller_kernel, chunk_rows=chunk_rows)
    out = pl.pallas_call(
        kernel,
        out_shape=jax.ShapeDtypeStruct((Bp // g, g * d_action), jnp.float32),
        grid=(n_blocks,),
        in_specs=in_specs,
        out_specs=out_specs,
        compiler_params=pltpu.CompilerParams(
            dimension_semantics=("parallel",),
            vmem_limit_bytes=vmem_limit),
        cost_estimate=cost,
    )(Xp, Tp, w1x_p, w1t_p, b1_p, w2_p, b2_p, w3_p, b3_p)

    out = out.reshape(Bp, d_action)
    return out[:B] if Bp != B else out


def init_params(key, d_state, d_action):
    """Deterministic init mimicking torch.nn.Linear (U(-1/sqrt(fan_in), 1/sqrt(fan_in)))."""
    def linear(k, fan_in, fan_out):
        kw, kb = jax.random.split(k)
        bound = 1.0 / jnp.sqrt(jnp.float32(fan_in))
        w = jax.random.uniform(kw, (fan_in, fan_out), jnp.float32, -bound, bound)
        b = jax.random.uniform(kb, (1, fan_out), jnp.float32, -bound, bound)
        return w, b

    k1, k2, k3 = jax.random.split(key, 3)
    w1, b1 = linear(k1, d_state + 1, 32)
    w2, b2 = linear(k2, 32, 32)
    w3, b3 = linear(k3, 32, d_action)
    return (w1, b1, w2, b2, w3, b3)


def reference_forward(X, T, params):
    w1, b1, w2, b2, w3, b3 = params
    xt = jnp.concatenate([X, T], axis=1)
    h1 = jnp.maximum(xt @ w1 + b1, 0.0)
    h2 = jnp.maximum(h1 @ w2 + b2, 0.0)
    return h2 @ w3 + b3


if __name__ == "__main__":
    B, d_state, d_action = 8, 7, 4
    key = jax.random.PRNGKey(0)
    kx, kt, kp = jax.random.split(key, 3)

    X = jax.random.normal(kx, (B, d_state), jnp.float32)
    T = jax.random.normal(kt, (B, 1), jnp.float32)
    params = init_params(kp, d_state, d_action)

    # f32 path, single grid step, tiny batch.
    out = jax.block_until_ready(controller_forward(X, T, params))
    ref = reference_forward(X, T, params)
    assert out.shape == (B, d_action)
    assert jnp.allclose(out, ref, atol=1e-5, rtol=1e-5)

    # Tiled path: non-multiple-of-tile batch, >=2 grid steps (v7x megacore).
    B2 = 1000
    kx2, kt2 = jax.random.split(jax.random.PRNGKey(1))
    X2 = jax.random.normal(kx2, (B2, d_state), jnp.float32)
    T2 = jax.random.normal(kt2, (B2, 1), jnp.float32)
    out2 = jax.block_until_ready(controller_forward(X2, T2, params))
    ref2 = reference_forward(X2, T2, params)
    assert out2.shape == (B2, d_action)
    assert jnp.allclose(out2, ref2, atol=1e-5, rtol=1e-5)

    # bf16 production path (halved HBM read traffic, bf16 MXU); loose tolerance.
    out3 = jax.block_until_ready(
        controller_forward(X2, T2, params, input_dtype=jnp.bfloat16))
    assert out3.shape == (B2, d_action)
    assert jnp.allclose(out3, ref2, atol=1e-1, rtol=1e-1)

    print("KERNEL_OK")
</pallas_src>

<mosaic_0001>
module attributes {stable_mosaic.version = 11 : i64} {
  func.func @controller_kernel(%arg0: i32, %arg1: memref<8x28xf32, #tpu.memory_space<vmem>>, %arg2: memref<8x4xf32, #tpu.memory_space<vmem>>, %arg3: memref<28x128xf32, #tpu.memory_space<vmem>>, %arg4: memref<4x128xf32, #tpu.memory_space<vmem>>, %arg5: memref<1x128xf32, #tpu.memory_space<vmem>>, %arg6: memref<128x128xf32, #tpu.memory_space<vmem>>, %arg7: memref<1x128xf32, #tpu.memory_space<vmem>>, %arg8: memref<128x16xf32, #tpu.memory_space<vmem>>, %arg9: memref<1x16xf32, #tpu.memory_space<vmem>>, %arg10: memref<8x16xf32, #tpu.memory_space<vmem>>) attributes {dimension_semantics = [#tpu.dimension_semantics<parallel>], iteration_bounds = array<i64: 1>, scalar_prefetch = 0 : i64, scratch_operands = 0 : i64, tpu.core_type = #tpu.core_type<tc>, window_params = [{transform_indices = @transform_0, window_bounds = array<i64: 8, 28>}, {transform_indices = @transform_1, window_bounds = array<i64: 8, 4>}, {pipeline_mode = #tpu.pipeline_mode<synchronous>, transform_indices = @transform_2, window_bounds = array<i64: 28, 128>}, {pipeline_mode = #tpu.pipeline_mode<synchronous>, transform_indices = @transform_3, window_bounds = array<i64: 4, 128>}, {pipeline_mode = #tpu.pipeline_mode<synchronous>, transform_indices = @transform_4, window_bounds = array<i64: 1, 128>}, {pipeline_mode = #tpu.pipeline_mode<synchronous>, transform_indices = @transform_5, window_bounds = array<i64: 128, 128>}, {pipeline_mode = #tpu.pipeline_mode<synchronous>, transform_indices = @transform_6, window_bounds = array<i64: 1, 128>}, {pipeline_mode = #tpu.pipeline_mode<synchronous>, transform_indices = @transform_7, window_bounds = array<i64: 128, 16>}, {pipeline_mode = #tpu.pipeline_mode<synchronous>, transform_indices = @transform_8, window_bounds = array<i64: 1, 16>}, {transform_indices = @transform_9, window_bounds = array<i64: 8, 16>}]} {
    %c0 = arith.constant 0 : index
    %c0_0 = arith.constant 0 : index
    %0 = vector.load %arg3[%c0, %c0_0] : memref<28x128xf32, #tpu.memory_space<vmem>>, vector<28x128xf32>
    %c0_1 = arith.constant 0 : index
    %c0_2 = arith.constant 0 : index
    %1 = vector.load %arg4[%c0_1, %c0_2] : memref<4x128xf32, #tpu.memory_space<vmem>>, vector<4x128xf32>
    %c0_3 = arith.constant 0 : index
    %c0_4 = arith.constant 0 : index
    %2 = vector.load %arg5[%c0_3, %c0_4] : memref<1x128xf32, #tpu.memory_space<vmem>>, vector<1x128xf32>
    %c0_5 = arith.constant 0 : index
    %c0_6 = arith.constant 0 : index
    %3 = vector.load %arg6[%c0_5, %c0_6] : memref<128x128xf32, #tpu.memory_space<vmem>>, vector<128x128xf32>
    %c0_7 = arith.constant 0 : index
    %c0_8 = arith.constant 0 : index
    %4 = vector.load %arg7[%c0_7, %c0_8] : memref<1x128xf32, #tpu.memory_space<vmem>>, vector<1x128xf32>
    %c0_9 = arith.constant 0 : index
    %c0_10 = arith.constant 0 : index
    %5 = vector.load %arg8[%c0_9, %c0_10] : memref<128x16xf32, #tpu.memory_space<vmem>>, vector<128x16xf32>
    %c0_11 = arith.constant 0 : index
    %c0_12 = arith.constant 0 : index
    %6 = vector.load %arg9[%c0_11, %c0_12] : memref<1x16xf32, #tpu.memory_space<vmem>>, vector<1x16xf32>
    %c0_i32 = arith.constant 0 : i32
    %c8_i32 = arith.constant 8 : i32
    %7 = arith.muli %c0_i32, %c8_i32 : i32
    %8 = tpu.assume_multiple %7, 8 : i32
    %9 = arith.index_cast %8 : i32 to index
    %c0_13 = arith.constant 0 : index
    %10 = vector.load %arg1[%9, %c0_13] : memref<8x28xf32, #tpu.memory_space<vmem>>, vector<8x28xf32>
    %11 = arith.index_cast %8 : i32 to index
    %c0_14 = arith.constant 0 : index
    %12 = vector.load %arg2[%11, %c0_14] : memref<8x4xf32, #tpu.memory_space<vmem>>, vector<8x4xf32>
    %cst = arith.constant dense<0.000000e+00> : vector<8x128xf32>
    %13 = tpu.matmul %10, %0, %cst {dimension_numbers = #tpu.dot_dimension_numbers<[1], [0], [0], [1], [0, 0, 1, 1], [], []>} : vector<8x28xf32>, vector<28x128xf32>, vector<8x128xf32> -> vector<8x128xf32>
    %cst_15 = arith.constant dense<0.000000e+00> : vector<8x128xf32>
    %14 = tpu.matmul %12, %1, %cst_15 {dimension_numbers = #tpu.dot_dimension_numbers<[1], [0], [0], [1], [0, 0, 1, 1], [], []>} : vector<8x4xf32>, vector<4x128xf32>, vector<8x128xf32> -> vector<8x128xf32>
    %15 = arith.addf %13, %14 : vector<8x128xf32>
    %16 = vector.broadcast %2 : vector<1x128xf32> to vector<8x128xf32>
    %17 = arith.addf %15, %16 : vector<8x128xf32>
    %cst_16 = arith.constant 0.000000e+00 : f32
    %18 = vector.broadcast %cst_16 : f32 to vector<8x128xf32>
    %19 = arith.maximumf %17, %18 : vector<8x128xf32>
    %cst_17 = arith.constant dense<0.000000e+00> : vector<8x128xf32>
    %20 = tpu.matmul %19, %3, %cst_17 {dimension_numbers = #tpu.dot_dimension_numbers<[1], [0], [0], [1], [0, 0, 1, 1], [], []>} : vector<8x128xf32>, vector<128x128xf32>, vector<8x128xf32> -> vector<8x128xf32>
    %21 = vector.broadcast %4 : vector<1x128xf32> to vector<8x128xf32>
    %22 = arith.addf %20, %21 : vector<8x128xf32>
    %cst_18 = arith.constant 0.000000e+00 : f32
    %23 = vector.broadcast %cst_18 : f32 to vector<8x128xf32>
    %24 = arith.maximumf %22, %23 : vector<8x128xf32>
    %cst_19 = arith.constant dense<0.000000e+00> : vector<8x16xf32>
    %25 = tpu.matmul %24, %5, %cst_19 {dimension_numbers = #tpu.dot_dimension_numbers<[1], [0], [0], [1], [0, 0, 1, 1], [], []>} : vector<8x128xf32>, vector<128x16xf32>, vector<8x16xf32> -> vector<8x16xf32>
    %26 = vector.broadcast %6 : vector<1x16xf32> to vector<8x16xf32>
    %27 = arith.addf %25, %26 : vector<8x16xf32>
    %28 = arith.index_cast %8 : i32 to index
    %c0_20 = arith.constant 0 : index
    %29 = vector.load %arg10[%28, %c0_20] : memref<8x16xf32, #tpu.memory_space<vmem>>, vector<8x16xf32>
    tpu.vector_store %arg10[%28, %c0_20], %27 {strides = array<i32>} : memref<8x16xf32, #tpu.memory_space<vmem>>, vector<8x16xf32>,
    %c1_i32 = arith.constant 1 : i32
    return
  }
  func.func @transform_0(%arg0: i32) -> (i32, i32) {
    %c0_i32 = arith.constant 0 : i32
    %c0_i32_0 = arith.constant 0 : i32
    return %arg0, %c0_i32 : i32, i32
  }
  func.func @transform_1(%arg0: i32) -> (i32, i32) {
    %c0_i32 = arith.constant 0 : i32
    %c0_i32_0 = arith.constant 0 : i32
    return %arg0, %c0_i32 : i32, i32
  }
  func.func @transform_2(%arg0: i32) -> (i32, i32) {
    %c0_i32 = arith.constant 0 : i32
    %c0_i32_0 = arith.constant 0 : i32
    %c0_i32_1 = arith.constant 0 : i32
    return %c0_i32, %c0_i32_0 : i32, i32
  }
  func.func @transform_3(%arg0: i32) -> (i32, i32) {
    %c0_i32 = arith.constant 0 : i32
    %c0_i32_0 = arith.constant 0 : i32
    %c0_i32_1 = arith.constant 0 : i32
    return %c0_i32, %c0_i32_0 : i32, i32
  }
  func.func @transform_4(%arg0: i32) -> (i32, i32) {
    %c0_i32 = arith.constant 0 : i32
    %c0_i32_0 = arith.constant 0 : i32
    %c0_i32_1 = arith.constant 0 : i32
    return %c0_i32, %c0_i32_0 : i32, i32
  }
  func.func @transform_5(%arg0: i32) -> (i32, i32) {
    %c0_i32 = arith.constant 0 : i32
    %c0_i32_0 = arith.constant 0 : i32
    %c0_i32_1 = arith.constant 0 : i32
    return %c0_i32, %c0_i32_0 : i32, i32
  }
  func.func @transform_6(%arg0: i32) -> (i32, i32) {
    %c0_i32 = arith.constant 0 : i32
    %c0_i32_0 = arith.constant 0 : i32
    %c0_i32_1 = arith.constant 0 : i32
    return %c0_i32, %c0_i32_0 : i32, i32
  }
  func.func @transform_7(%arg0: i32) -> (i32, i32) {
    %c0_i32 = arith.constant 0 : i32
    %c0_i32_0 = arith.constant 0 : i32
    %c0_i32_1 = arith.constant 0 : i32
    return %c0_i32, %c0_i32_0 : i32, i32
  }
  func.func @transform_8(%arg0: i32) -> (i32, i32) {
    %c0_i32 = arith.constant 0 : i32
    %c0_i32_0 = arith.constant 0 : i32
    %c0_i32_1 = arith.constant 0 : i32
    return %c0_i32, %c0_i32_0 : i32, i32
  }
  func.func @transform_9(%arg0: i32) -> (i32, i32) {
    %c0_i32 = arith.constant 0 : i32
    %c0_i32_0 = arith.constant 0 : i32
    return %arg0, %c0_i32 : i32, i32
  }
}

</mosaic_0001>

<bundles_post_ra>
// kernel: tpu_custom_call.1
= control target key start
LH: loop header
LB: loop body
LE: loop exit
PB: predicated region body
PF: predicated region fallthrough
CT: control target
= control target key end

     0   :  { %14 = vsyncpa [#allocation3], 0  ;;  %s830_s0 = inlined_call_operand.hbm [shape: f32[8,28], index: 0, kind: input, shape index: {}]   ;;  %s831_s1 = inlined_call_operand.vmem [shape: f32[8,4], index: 1, kind: input, shape index: {}]   ;;  %s832_s2 = inlined_call_operand.vmem [shape: f32[28,128], index: 2, kind: input, shape index: {}]   ;;  %s833_s3 = inlined_call_operand.vmem [shape: f32[4,128], index: 3, kind: input, shape index: {}]   ;;  %s834_s4 = inlined_call_operand.vmem [shape: f32[1,128], index: 4, kind: input, shape index: {}]   ;;  %s835_s5 = inlined_call_operand.vmem [shape: f32[128,128], index: 5, kind: input, shape index: {}]   ;;  %s836_s6 = inlined_call_operand.vmem [shape: f32[1,128], index: 6, kind: input, shape index: {}]   ;;  %s837_s7 = inlined_call_operand.vmem [shape: f32[128,16], index: 7, kind: input, shape index: {}]   ;;  %s838_s8 = inlined_call_operand.vmem [shape: f32[1,16], index: 8, kind: input, shape index: {}]   ;;  %s839_s9 = inlined_call_operand.hbm [shape: f32[8,16], index: 9, kind: output, shape index: {}]  }
   0x1   :  { %15 = vsyncpa [#allocation4], 0  ;;  %s602_s30 = smov [#allocation2]  }
   0x2   :  { %s22_s10 = sshll.u32 %s602_s30, 4  ;;  %s23_s10 = int_to_ptr.vmem [resolvable:$true] %s22_s10 }
   0x3   :  { %s566_s11 = scalar_lea.vmem %s23_s10, 128  ;;  %p571_p1 = scmp.lt.s32.totalorder %s23_s10, %s23_s10 }
   0x4   :  { %p567_p0 = scmp.ne.s32.totalorder %s23_s10, %s566_s11  ;;  %p572_p2 = scmp.lt.s32.totalorder %s566_s11, %s566_s11 }
   0x6   :  { %p573_p3 = por %p572_p2, %p571_p1 }
   0x8   :  { %p574_p4 = pnand %p573_p3, %p567_p0 }
   0xa   :  { %577 = shalt.err (!%p574_p4)
}
   0xb   :  { %25 = dma.hbm_to_vmem [thread:$0]  %s830_s0, 128, %s23_s10, [#allocation3]  }
   0xc   :  { %598 = dma.done.wait [#allocation3], 128  }
   0xd   :  { %599 = vsyncadd [#allocation3], 4294967168  ;;  %v603_v0 = vmov 0.0   ;;  %vm604_vm0 = vmmov 0   ;;  %vm91_vm1 = vcmask 1043456   ;;  %vm87_vm2 = vcmask 31744  }
   0xe   :  { %473 = vmatprep.subr.mxu1 %v603_v0  ;;  %468 = vmatprep.subr.mxu0 %v603_v0  ;;  %v48_v1 = vld [vmem:[%s832_s2 + $0x18] sm:$0xf]  ;;  %v47_v2 = vld [vmem:[%s832_s2 + $0x10] sm:$0xff]  ;;  %v49_v3 = vld [vmem:[%s833_s3] sm:$0xf]  ;;  %vm165_vm3 = vcmask 228352  }
   0xf   :  { %470 = vmatprep.mubr.msk.f32.mxu0 %vm604_vm0, %v603_v0  ;;  %481 = vmatprep.mubr.msk.f32.mxu1 %vm604_vm0, %v603_v0  ;;  %v86_v4 = vld [vmem:[%s831_s1] sm:$0xff]  ;;  %v46_v5 = vld [vmem:[%s832_s2 + $0x8] sm:$0xff]  ;;  %v66_v6 = vld [vmem:[%s835_s5 + $0x78] sm:$0xff]  ;;  %s605_s17 = smov [#allocation5]   ;;  %vm403_vm4 = vcmask 130048  }
  0x10   :  { %474 = vmatpush3.msk.msra.mxu1 %vm91_vm1, %v48_v1  ;;  %469 = vmatpush3.msk.msra.mxu0 %vm91_vm1, %v49_v3  ;;  %v65_v7 = vld [vmem:[%s835_s5 + $0x70] sm:$0xff]  ;;  %v45_v8 = vld [vmem:[%s832_s2] sm:$0xff]  ;;  %v64_v10 = vld [vmem:[%s835_s5 + $0x68] sm:$0xff]  ;;  %s411_s18 = sshll.u32 %s605_s17, 4  ;;  %s412_s18 = int_to_ptr.vmem [resolvable:$true] %s411_s18 }
  0x11   :  { %475 = vmatprep.subr.mxu1 %v603_v0  ;;  %471 = vmatmul.mubr.msk.f32.vlgmr.msra.gmra.mxu0 %vm87_vm2, %v86_v4  ;;  %v85_v9 = vld [vmem:[#allocation2] sm:$0xff]  ;;  %v62_v12 = vld [vmem:[%s835_s5 + $0x58] sm:$0xff]  ;;  %v61_v13 = vld [vmem:[%s835_s5 + $0x50] sm:$0xff]  ;;  %p583_p6 = scmp.lt.s32.totalorder %s412_s18, %s412_s18 }
  0x12   :  { %476 = vmatpush3.msra.mxu1 %v47_v2  ;;  %484 = vmatprep.subr.mxu0 %v603_v0  ;;  %v63_v11 = vld [vmem:[%s835_s5 + $0x60] sm:$0xff]  ;;  %v60_v14 = vld [vmem:[%s835_s5 + $0x48] sm:$0xff]  ;;  %v58_v16 = vld [vmem:[%s835_s5 + $0x38] sm:$0xff] }
  0x13   :  { %477 = vmatprep.subr.mxu1 %v603_v0  ;;  %485 = vmatpush3.msra.mxu0 %v66_v6  ;;  %v59_v15 = vld [vmem:[%s835_s5 + $0x40] sm:$0xff]  ;;  %v57_v17 = vld [vmem:[%s835_s5 + $0x30] sm:$0xff]  ;;  %v56_v18 = vld [vmem:[%s835_s5 + $0x28] sm:$0xff] }
  0x14   :  { %478 = vmatpush3.msra.mxu1 %v46_v5  ;;  %486 = vmatprep.subr.mxu0 %v603_v0  ;;  %v55_v19 = vld [vmem:[%s835_s5 + $0x20] sm:$0xff]  ;;  %v54_v20 = vld [vmem:[%s835_s5 + $0x18] sm:$0xff]  ;;  %v53_v21 = vld [vmem:[%s835_s5 + $0x10] sm:$0xff] }
  0x15   :  { %479 = vmatprep.subr.mxu1 %v603_v0  ;;  %487 = vmatpush3.msra.mxu0 %v65_v7  ;;  %v52_v22 = vld [vmem:[%s835_s5 + $0x8] sm:$0xff]  ;;  %v51_v23 = vld [vmem:[%s835_s5] sm:$0xff]  ;;  %v83_v24 = vld [vmem:[%s837_s7 + $0x78] sm:$0xff] }
  0x16   :  { %480 = vmatpush3.msra.mxu1 %v45_v8  ;;  %488 = vmatprep.subr.mxu0 %v603_v0  ;;  %v82_v25 = vld [vmem:[%s837_s7 + $0x70] sm:$0xff]  ;;  %v81_v26 = vld [vmem:[%s837_s7 + $0x68] sm:$0xff]  ;;  %v80_v27 = vld [vmem:[%s837_s7 + $0x60] sm:$0xff] }
  0x17   :  { %482 = vmatmul.mubr.msk.f32.vlgmr.msra.gmra.mxu1 %vm165_vm3, %v85_v9  ;;  %489 = vmatpush3.msra.mxu0 %v64_v10  ;;  %v79_v28 = vld [vmem:[%s837_s7 + $0x58] sm:$0xff]  ;;  %v78_v29 = vld [vmem:[%s837_s7 + $0x50] sm:$0xff]  ;;  %v77_v30 = vld [vmem:[%s837_s7 + $0x48] sm:$0xff] }
  0x18   :  { %490 = vmatprep.subr.mxu0 %v603_v0  ;;  %516 = vmatprep.mubr.msk.f32.mxu0 %vm604_vm0, %v603_v0  ;;  %v76_v31 = vld [vmem:[%s837_s7 + $0x40] sm:$0xff]  ;;  %v75_v32 = vld [vmem:[%s837_s7 + $0x38] sm:$0xff]  ;;  %v74_v33 = vld [vmem:[%s837_s7 + $0x30] sm:$0xff] }
  0x19   :  { %491 = vmatpush3.msra.mxu0 %v63_v11  ;;  %519 = vmatprep.subr.mxu1 %v603_v0  ;;  %v73_v34 = vld [vmem:[%s837_s7 + $0x28] sm:$0xff]  ;;  %v72_v35 = vld [vmem:[%s837_s7 + $0x20] sm:$0xff]  ;;  %v71_v36 = vld [vmem:[%s837_s7 + $0x18] sm:$0xff] }
  0x1a   :  { %492 = vmatprep.subr.mxu0 %v603_v0  ;;  %551 = vmatprep.mubr.msk.f32.mxu1 %vm604_vm0, %v603_v0  ;;  %v424_v39 = vld [vmem:[%s834_s4] ss:$0 sm:$0xff]  ;;  %v70_v45 = vld [vmem:[%s837_s7 + $0x10] sm:$0xff]  ;;  %v69_v46 = vld [vmem:[%s837_s7 + $0x8] sm:$0xff] }
  0x1b   :  { %493 = vmatpush3.msra.mxu0 %v62_v12  ;;  %520 = vmatpush3.msra.mxu1 %v83_v24  ;;  %v68_v47 = vld [vmem:[%s837_s7] sm:$0xff]  ;;  %s578_s7 = scalar_lea.vmem %s412_s18, 128 }
  0x1c   :  { %494 = vmatprep.subr.mxu0 %v603_v0  ;;  %521 = vmatprep.subr.mxu1 %v603_v0  ;;  %v425_v48 = vld [vmem:[%s836_s6] ss:$0 sm:$0xff]  ;;  %p579_p5 = scmp.ne.s32.totalorder %s412_s18, %s578_s7  ;;  %p584_p7 = scmp.lt.s32.totalorder %s578_s7, %s578_s7 }
  0x1d   :  { %495 = vmatpush3.msra.mxu0 %v61_v13  ;;  %522 = vmatpush3.msra.mxu1 %v82_v25  ;;  %v426_v53 = vld [vmem:[%s838_s8] ss:$0 sm:$0xff] }
  0x1e   :  { %496 = vmatprep.subr.mxu0 %v603_v0  ;;  %523 = vmatprep.subr.mxu1 %v603_v0  ;;  %p585_p8 = por %p584_p7, %p583_p6 }
  0x1f   :  { %497 = vmatpush3.msra.mxu0 %v60_v14  ;;  %524 = vmatpush3.msra.mxu1 %v81_v26 }
  0x20   :  { %498 = vmatprep.subr.mxu0 %v603_v0  ;;  %525 = vmatprep.subr.mxu1 %v603_v0  ;;  %p586_p9 = pnand %p585_p8, %p579_p5 }
  0x21   :  { %499 = vmatpush3.msra.mxu0 %v59_v15  ;;  %526 = vmatpush3.msra.mxu1 %v80_v27 }
  0x22   :  { %500 = vmatprep.subr.mxu0 %v603_v0  ;;  %527 = vmatprep.subr.mxu1 %v603_v0 }
  0x23   :  { %501 = vmatpush3.msra.mxu0 %v58_v16  ;;  %528 = vmatpush3.msra.mxu1 %v79_v28 }
  0x24   :  { %502 = vmatprep.subr.mxu0 %v603_v0  ;;  %529 = vmatprep.subr.mxu1 %v603_v0 }
  0x25   :  { %503 = vmatpush3.msra.mxu0 %v57_v17  ;;  %530 = vmatpush3.msra.mxu1 %v78_v29 }
  0x26   :  { %504 = vmatprep.subr.mxu0 %v603_v0  ;;  %531 = vmatprep.subr.mxu1 %v603_v0 }
  0x27   :  { %505 = vmatpush3.msra.mxu0 %v56_v18  ;;  %532 = vmatpush3.msra.mxu1 %v77_v30 }
  0x28   :  { %506 = vmatprep.subr.mxu0 %v603_v0  ;;  %533 = vmatprep.subr.mxu1 %v603_v0 }
  0x29   :  { %507 = vmatpush3.msra.mxu0 %v55_v19  ;;  %534 = vmatpush3.msra.mxu1 %v76_v31 }
  0x2a   :  { %508 = vmatprep.subr.mxu0 %v603_v0  ;;  %535 = vmatprep.subr.mxu1 %v603_v0 }
  0x2b   :  { %509 = vmatpush3.msra.mxu0 %v54_v20  ;;  %536 = vmatpush3.msra.mxu1 %v75_v32 }
  0x2c   :  { %510 = vmatprep.subr.mxu0 %v603_v0  ;;  %537 = vmatprep.subr.mxu1 %v603_v0 }
  0x2d   :  { %511 = vmatpush3.msra.mxu0 %v53_v21  ;;  %538 = vmatpush3.msra.mxu1 %v74_v33 }
  0x2e   :  { %512 = vmatprep.subr.mxu0 %v603_v0  ;;  %539 = vmatprep.subr.mxu1 %v603_v0 }
  0x2f   :  { %513 = vmatpush3.msra.mxu0 %v52_v22  ;;  %540 = vmatpush3.msra.mxu1 %v73_v34 }
  0x30   :  { %514 = vmatprep.subr.mxu0 %v603_v0  ;;  %541 = vmatprep.subr.mxu1 %v603_v0 }
  0x31   :  { %515 = vmatpush3.msra.mxu0 %v51_v23  ;;  %542 = vmatpush3.msra.mxu1 %v72_v35 }
  0x32   :  { %543 = vmatprep.subr.mxu1 %v603_v0 }
  0x33   :  { %544 = vmatpush3.msra.mxu1 %v71_v36 }
  0x34   :  { %545 = vmatprep.subr.mxu1 %v603_v0 }
  0x35   :  { %546 = vmatpush3.msra.mxu1 %v70_v45 }
  0x36   :  { %547 = vmatprep.subr.mxu1 %v603_v0 }
  0x37   :  { %548 = vmatpush3.msra.mxu1 %v69_v46 }
  0x38   :  { %549 = vmatprep.subr.mxu1 %v603_v0 }
  0x39   :  { %550 = vmatpush3.msra.mxu1 %v68_v47 }
  0xd1   :  { %v161_v37 = vpop.f32.mrf.mxu0 }
  0xd3   :  { %v472_v38 = vpop.f32.mrf.mxu0 }
  0xd7   :  { %v238_v40 = vpop.f32.mrf.mxu1 }
  0xd8   :  { %v239_v41 = vadd.f32 %v238_v40, %v161_v37 }
  0xd9   :  { %v483_v42 = vpop.f32.mrf.mxu1 }
  0xda   :  { %v248_v43 = vadd.f32 %v424_v39, %v239_v41 }
  0xdc   :  { %v249_v44 = vmax.f32 %v248_v43, 0.0 }
  0xde   :  { %517 = vmatmul.mubr.f32.vlgmr.msra.gmra.mxu0 %v249_v44 }
 0x19e   :  { %v322_v49 = vpop.f32.mrf.mxu0 }
 0x19f   :  { %v323_v50 = vadd.f32 %v425_v48, %v322_v49 }
 0x1a0   :  { %v518_v51 = vpop.f32.mrf.mxu0 }
 0x1a1   :  { %v326_v52 = vmax.f32 %v323_v50, 0.0 }
 0x1a3   :  { %552 = vmatmul.mubr.f32.vlgmr.msra.gmra.mxu1 %v326_v52 }
 0x263   :  { %v399_v54 = vpop.f32.mrf.mxu1 }
 0x264   :  { %v400_v55 = vadd.f32 %v426_v53, %v399_v54 }
 0x265   :  { %v553_v56 = vpop.f32.mrf.mxu1 }
 0x266   :  { %404 = vst.msk [vmem:[#allocation5] sm:$0xff] %vm403_vm4, %v400_v55 }
 0x267   :  { %589 = shalt.err (!%p586_p9)
}
 0x268   :  { %414 = dma.vmem_to_hbm [thread:$0]  %s412_s18, 128, %s839_s9, [#allocation4]  }
 0x269   :  { %600 = dma.done.wait [#allocation4], 128  }
 0x26a   :  { %601 = vsyncadd [#allocation4], 4294967168 }
 0x26b   :  { %418 = vsyncpa [#allocation3], 1 }
 0x26c   :  { %419 = vsyncpa [#allocation4], 1 }

</bundles_post_ra>
